<compile_context>
chip_gen: v6e
topology: v6e:2x2x1
jax: 0.10.0
libtpu: 0.0.40
codegen_flags: <defaults>
</compile_context>

<pallas_src>
import functools

import jax
import jax.numpy as jnp
import numpy as np
from jax.experimental import pallas as pl
from jax.experimental.pallas import tpu as pltpu

POOLING_BREAKDOWN = {1: (1, 1), 2: (2, 1), 3: (3, 1), 4: (2, 2), 5: (5, 1),
                     6: (3, 2), 7: (7, 1), 8: (4, 2), 9: (3, 3)}

_VMEM_LIMIT_BYTES = 48 * 1024 * 1024   # safe on v5e/v6e (128 MiB) and v7x (64 MiB)


def _round_up(x, m):
    return (x + m - 1) // m * m


def _choose_tile_m(M):
    """Pick (tm, Mp): tm multiple of 16, <= 512, preferring exact divisors of M
    so no HBM pad/slice copy of the activation is needed."""
    for tm in range(512, 127, -16):
        if M % tm == 0:
            return tm, M
    Mp = _round_up(max(M, 16), 16)
    n_tiles = -(-Mp // 512)
    tm = _round_up(-(-Mp // n_tiles), 16)
    return tm, tm * n_tiles


def _choose_tile_k(Kp, max_tk=1024):
    """Largest tk <= max_tk that is a multiple of 128 and divides Kp exactly."""
    q = Kp // 128
    d = 1
    for cand in range(1, max_tk // 128 + 1):
        if q % cand == 0:
            d = cand
    return 128 * d


# --------------------------------------------------------------------------------------
# Pallas kernels
# --------------------------------------------------------------------------------------

def _matmul_bias_kernel(x_ref, w_ref, b_ref, o_ref, acc_ref, *, relu):
    """out = maybe_relu(X @ W + bias).  Grid = (m, n, k), k innermost."""
    k = pl.program_id(2)

    @pl.when(k == 0)
    def _():
        acc_ref[...] = jnp.zeros_like(acc_ref)

    acc_ref[...] += jnp.dot(x_ref[...], w_ref[...],
                            preferred_element_type=jnp.float32)

    @pl.when(k == pl.num_programs(2) - 1)
    def _():
        y = acc_ref[...] + b_ref[...]          # epilogue math in f32 (v5e friendly)
        if relu:
            y = jnp.maximum(y, 0.0)
        o_ref[...] = y.astype(o_ref.dtype)


def _matmul_bias_res_kernel(x_ref, w_ref, b_ref, r_ref, o_ref, acc_ref, *, relu):
    """out = maybe_relu(X @ W + bias + residual)."""
    k = pl.program_id(2)

    @pl.when(k == 0)
    def _():
        acc_ref[...] = jnp.zeros_like(acc_ref)

    acc_ref[...] += jnp.dot(x_ref[...], w_ref[...],
                            preferred_element_type=jnp.float32)

    @pl.when(k == pl.num_programs(2) - 1)
    def _():
        y = acc_ref[...] + b_ref[...] + r_ref[...].astype(jnp.float32)
        if relu:
            y = jnp.maximum(y, 0.0)
        o_ref[...] = y.astype(o_ref.dtype)


def _max_over_taps_kernel(x_ref, o_ref):
    # x_ref: (9, tm, Cp) -> max over the 9 pooling taps.
    o_ref[...] = jnp.max(x_ref[...], axis=0)


def _adaptive_pool_kernel(x_ref, o_ref, *, regions):
    # x_ref: (Bp, H, W, Cp) bf16; o_ref: (ph*pw, Bp, Cp) f32.  Regions static.
    for idx, (h0, h1, w0, w1, inv_area) in enumerate(regions):
        win = x_ref[:, h0:h1, w0:w1, :].astype(jnp.float32)
        o_ref[idx] = jnp.sum(win, axis=(1, 2)) * inv_area


# --------------------------------------------------------------------------------------
# Pallas-call wrappers
# --------------------------------------------------------------------------------------

def _fused_matmul_bias(x2d, w, bias, residual, relu):
    """x2d (M, K<=Kp), w (Kp, Np) bf16 (BN scale folded in), bias (1, Np) f32."""
    M, K = x2d.shape
    Kp, Np = w.shape
    assert Kp % 128 == 0 and Np % 128 == 0 and Kp >= K

    tm, Mp = _choose_tile_m(M)
    tn = 256 if Np % 256 == 0 else 128
    tk = _choose_tile_k(Kp)

    xp = x2d.astype(jnp.bfloat16)
    if (Mp, Kp) != (M, K):
        xp = jnp.pad(xp, ((0, Mp - M), (0, Kp - K)))

    in_specs = [
        pl.BlockSpec((tm, tk), lambda m, n, k: (m, k)),
        pl.BlockSpec((tk, tn), lambda m, n, k: (k, n)),
        pl.BlockSpec((1, tn), lambda m, n, k: (0, n)),
    ]
    args = [xp, w, bias]
    if residual is not None:
        rp = residual.astype(jnp.bfloat16)
        assert rp.shape[1] == Np
        if Mp != M:
            rp = jnp.pad(rp, ((0, Mp - M), (0, 0)))
        in_specs.append(pl.BlockSpec((tm, tn), lambda m, n, k: (m, n)))
        args.append(rp)
        kernel = functools.partial(_matmul_bias_res_kernel, relu=relu)
    else:
        kernel = functools.partial(_matmul_bias_kernel, relu=relu)

    out = pl.pallas_call(
        kernel,
        out_shape=jax.ShapeDtypeStruct((Mp, Np), jnp.bfloat16),
        grid_spec=pltpu.PrefetchScalarGridSpec(
            num_scalar_prefetch=0,
            grid=(Mp // tm, Np // tn, Kp // tk),
            in_specs=in_specs,
            out_specs=pl.BlockSpec((tm, tn), lambda m, n, k: (m, n)),
            scratch_shapes=[pltpu.VMEM((tm, tn), jnp.float32)],
        ),
        compiler_params=pltpu.CompilerParams(
            dimension_semantics=("parallel", "parallel", "arbitrary"),
            vmem_limit_bytes=_VMEM_LIMIT_BYTES),
    )(*args)
    if Mp != M:
        out = out[:M]
    return out


def _extract_patches(x, kh, kw, stride, pad):
    """im2col glue: NHWC -> (B*Ho*Wo, kh*kw*C); feature index = (dh*kw + dw)*C + c.
    1x1 stride-1 convs are a free reshape (no HBM copy)."""
    B, H, W, C = x.shape
    Ho = (H + 2 * pad - kh) // stride + 1
    Wo = (W + 2 * pad - kw) // stride + 1
    if kh == 1 and kw == 1 and pad == 0:
        if stride == 1:
            return x.reshape(B * H * W, C), (B, H, W)
        xs = x[:, ::stride, ::stride, :]
        return xs.reshape(B * Ho * Wo, C), (B, Ho, Wo)
    xp = jnp.pad(x, ((0, 0), (pad, pad), (pad, pad), (0, 0)))
    cols = [xp[:, dh:dh + stride * (Ho - 1) + 1:stride,
               dw:dw + stride * (Wo - 1) + 1:stride, :]
            for dh in range(kh) for dw in range(kw)]
    patches = jnp.concatenate(cols, axis=-1)
    return patches.reshape(B * Ho * Wo, kh * kw * C), (B, Ho, Wo)


@functools.partial(jax.jit, static_argnames=("kh", "kw", "stride", "pad", "relu"))
def conv_bn(x, w, bias, residual=None, *, kh, kw, stride, pad, relu):
    patches, (B, Ho, Wo) = _extract_patches(x, kh, kw, stride, pad)
    res2d = None if residual is None else residual.reshape(-1, residual.shape[-1])
    out2d = _fused_matmul_bias(patches, w, bias, res2d, relu)
    return out2d.reshape(B, Ho, Wo, out2d.shape[-1])


@jax.jit
def maxpool_3x3_s2_p1(x):
    B, H, W, C = x.shape
    Ho = (H + 2 - 3) // 2 + 1
    Wo = (W + 2 - 3) // 2 + 1
    xp = jnp.pad(x, ((0, 0), (1, 1), (1, 1), (0, 0)), constant_values=-jnp.inf)
    taps = [xp[:, dh:dh + 2 * (Ho - 1) + 1:2, dw:dw + 2 * (Wo - 1) + 1:2, :]
            for dh in range(3) for dw in range(3)]
    M = B * Ho * Wo
    st = jnp.stack(taps, axis=0).reshape(9, M, C)
    tm, Mp = _choose_tile_m(M)
    Cp = _round_up(C, 128)
    if (Mp, Cp) != (M, C):
        st = jnp.pad(st, ((0, 0), (0, Mp - M), (0, Cp - C)))
    out = pl.pallas_call(
        _max_over_taps_kernel,
        out_shape=jax.ShapeDtypeStruct((Mp, Cp), x.dtype),
        grid_spec=pltpu.PrefetchScalarGridSpec(
            num_scalar_prefetch=0,
            grid=(Mp // tm,),
            in_specs=[pl.BlockSpec((9, tm, Cp), lambda m: (0, m, 0))],
            out_specs=pl.BlockSpec((tm, Cp), lambda m: (m, 0)),
        ),
        compiler_params=pltpu.CompilerParams(
            dimension_semantics=("parallel",),
            vmem_limit_bytes=_VMEM_LIMIT_BYTES),
    )(st)
    return out[:M, :C].reshape(B, Ho, Wo, C)


@functools.partial(jax.jit, static_argnames=("out_hw",))
def adaptive_avg_pool2d(x, out_hw):
    """PyTorch AdaptiveAvgPool2d semantics; returns (B, ph*pw, C) already in the
    flatten(start_dim=2).transpose(1, 2) order of the reference module."""
    B, H, W, C = x.shape
    ph, pw = out_hw
    regions = []
    for i in range(ph):
        h0 = (i * H) // ph
        h1 = -((-(i + 1) * H) // ph)
        for j in range(pw):
            w0 = (j * W) // pw
            w1 = -((-(j + 1) * W) // pw)
            regions.append((h0, h1, w0, w1, 1.0 / float((h1 - h0) * (w1 - w0))))
    regions = tuple(regions)
    Bp = _round_up(B, 8)        # sublane-dense output rows
    Cp = _round_up(C, 128)
    xp = x
    if (Bp, Cp) != (B, C):
        xp = jnp.pad(x, ((0, Bp - B), (0, 0), (0, 0), (0, Cp - C)))
    out = pl.pallas_call(
        functools.partial(_adaptive_pool_kernel, regions=regions),
        out_shape=jax.ShapeDtypeStruct((ph * pw, Bp, Cp), jnp.float32),
    )(xp)
    return jnp.transpose(out[:, :B, :C], (1, 0, 2))  # (B, ph*pw, C)


# --------------------------------------------------------------------------------------
# ResNet-152 parameters (synthetic, deterministic, BN folded / pre-padded) and forward
# --------------------------------------------------------------------------------------

def _bn_affine(key, c):
    gamma = jnp.full((c,), 0.5, jnp.float32)
    beta = 0.01 * jax.random.normal(key, (c,), dtype=jnp.float32)
    running_mean = jnp.zeros((c,), jnp.float32)
    running_var = jnp.ones((c,), jnp.float32)
    scale = gamma * jax.lax.rsqrt(running_var + 1e-5)
    bias = beta - running_mean * scale
    return scale, bias


def _packed_conv_bn(wkey, bkey, kh, kw, cin, cout, *, pad_cin_per_tap=True):
    """Returns (w_bf16 [Kp, Np], bias_f32 [1, Np]) with the BN scale folded into W.
    Weight layout matches im2col feature order (dh*kw + dw)*Cin(+pad) + c.
    TODO(synk): real pretrained OIHW weights would need the same permute+pad here."""
    fan_in = kh * kw * cin
    w = jax.random.normal(wkey, (kh, kw, cin, cout), dtype=jnp.float32) / np.sqrt(fan_in)
    scale, bias = _bn_affine(bkey, cout)
    w = w * scale                                  # fold eval-mode BN scale into W
    cout_p = _round_up(cout, 128)
    if pad_cin_per_tap:
        cin_p = _round_up(cin, 128)
        w = jnp.pad(w, ((0, 0), (0, 0), (0, cin_p - cin), (0, cout_p - cout)))
        w = w.reshape(kh * kw * cin_p, cout_p)
    else:
        w = w.reshape(kh * kw * cin, cout)
        kp = _round_up(kh * kw * cin, 128)
        w = jnp.pad(w, ((0, kp - kh * kw * cin), (0, cout_p - cout)))
    bias = jnp.pad(bias, (0, cout_p - cout)).reshape(1, cout_p)
    return w.astype(jnp.bfloat16), bias


def init_resnet152_params(key):
    keys = iter(jax.random.split(key, 1024))
    params = {"stem": _packed_conv_bn(next(keys), next(keys), 7, 7, 3, 64,
                                      pad_cin_per_tap=False)}
    layers = []
    in_c = 64
    # ResNet-152: bottleneck blocks per stage = (3, 8, 36, 3)
    for planes, n_blocks, layer_stride in ((64, 3, 1), (128, 8, 2), (256, 36, 2), (512, 3, 2)):
        blocks = []
        out_c = planes * 4
        for b in range(n_blocks):
            s = layer_stride if b == 0 else 1
            block = {
                "conv1": _packed_conv_bn(next(keys), next(keys), 1, 1, in_c, planes),
                "conv2": _packed_conv_bn(next(keys), next(keys), 3, 3, planes, planes),
                "conv3": _packed_conv_bn(next(keys), next(keys), 1, 1, planes, out_c),
            }
            if s != 1 or in_c != out_c:
                block["downsample"] = _packed_conv_bn(next(keys), next(keys), 1, 1, in_c, out_c)
            blocks.append(block)
            in_c = out_c
        layers.append(blocks)
    params["layers"] = layers
    return params


def image_encoder_forward(params, x_nchw, num_image_embeds):
    x = jnp.transpose(x_nchw, (0, 2, 3, 1)).astype(jnp.bfloat16)  # NCHW -> NHWC, bf16
    w, b = params["stem"]
    x = conv_bn(x, w, b, kh=7, kw=7, stride=2, pad=3, relu=True)
    x = maxpool_3x3_s2_p1(x)
    for li, blocks in enumerate(params["layers"]):
        layer_stride = 1 if li == 0 else 2
        for bi, blk in enumerate(blocks):
            s = layer_stride if bi == 0 else 1
            identity = x
            w1, b1 = blk["conv1"]
            out = conv_bn(x, w1, b1, kh=1, kw=1, stride=1, pad=0, relu=True)
            w2, b2 = blk["conv2"]
            out = conv_bn(out, w2, b2, kh=3, kw=3, stride=s, pad=1, relu=True)
            if "downsample" in blk:
                wd, bd = blk["downsample"]
                identity = conv_bn(x, wd, bd, kh=1, kw=1, stride=s, pad=0, relu=False)
            w3, b3 = blk["conv3"]
            x = conv_bn(out, w3, b3, residual=identity,
                        kh=1, kw=1, stride=1, pad=0, relu=True)
    ph, pw = POOLING_BREAKDOWN[num_image_embeds]
    # adaptive pool + flatten(start_dim=2) + transpose(1, 2)
    return adaptive_avg_pool2d(x, (ph, pw))  # (B, ph*pw, 2048) float32


if __name__ == "__main__":
    num_image_embeds = 4                       # POOLING_BREAKDOWN[4] = (2, 2)
    x = jax.random.normal(jax.random.PRNGKey(0), (2, 3, 16, 16), dtype=jnp.float32)
    params = init_resnet152_params(jax.random.PRNGKey(42))

    out = image_encoder_forward(params, x, num_image_embeds)
    out = jax.block_until_ready(out)

    assert out.shape == (2, num_image_embeds, 2048), out.shape
    assert bool(jnp.isfinite(out).all())
    print("KERNEL_OK")
</pallas_src>

<mosaic_0001>
module attributes {stable_mosaic.version = 11 : i64} {
  func.func @_matmul_bias_kernel(%arg0: i32, %arg1: i32, %arg2: i32, %arg3: memref<128x256xbf16, #tpu.memory_space<vmem>>, %arg4: memref<256x128xbf16, #tpu.memory_space<vmem>>, %arg5: memref<1x128xf32, #tpu.memory_space<vmem>>, %arg6: memref<128x128xbf16, #tpu.memory_space<vmem>>, %arg7: memref<128x128xf32, #tpu.memory_space<vmem>>) attributes {dimension_semantics = [#tpu.dimension_semantics<parallel>, #tpu.dimension_semantics<parallel>, #tpu.dimension_semantics<arbitrary>], iteration_bounds = array<i64: 1, 1, 1>, scalar_prefetch = 0 : i64, scratch_operands = 1 : i64, tpu.core_type = #tpu.core_type<tc>, window_params = [{transform_indices = @transform_0, window_bounds = array<i64: 128, 256>}, {transform_indices = @transform_1, window_bounds = array<i64: 256, 128>}, {transform_indices = @transform_2, window_bounds = array<i64: 1, 128>}, {transform_indices = @transform_3, window_bounds = array<i64: 128, 128>}]} {
    %c0_i32 = arith.constant 0 : i32
    %0 = arith.cmpi eq, %arg2, %c0_i32 : i32
    %1 = arith.extui %0 : i1 to i32
    %c0_i32_0 = arith.constant 0 : i32
    %2 = arith.cmpi ne, %1, %c0_i32_0 : i32
    scf.if %2 {
      %cst_10 = arith.constant 0.000000e+00 : f32
      %12 = vector.broadcast %cst_10 : f32 to vector<128x128xf32>
      %c0_11 = arith.constant 0 : index
      %c0_12 = arith.constant 0 : index
      %13 = vector.load %arg7[%c0_11, %c0_12] : memref<128x128xf32, #tpu.memory_space<vmem>>, vector<128x128xf32>
      tpu.vector_store %arg7[%c0_11, %c0_12], %12 {strides = array<i32>} : memref<128x128xf32, #tpu.memory_space<vmem>>, vector<128x128xf32>,
    } else {
    }
    %c0 = arith.constant 0 : index
    %c0_1 = arith.constant 0 : index
    %3 = vector.load %arg7[%c0, %c0_1] : memref<128x128xf32, #tpu.memory_space<vmem>>, vector<128x128xf32>
    %c0_2 = arith.constant 0 : index
    %c0_3 = arith.constant 0 : index
    %4 = vector.load %arg3[%c0_2, %c0_3] : memref<128x256xbf16, #tpu.memory_space<vmem>>, vector<128x256xbf16>
    %c0_4 = arith.constant 0 : index
    %c0_5 = arith.constant 0 : index
    %5 = vector.load %arg4[%c0_4, %c0_5] : memref<256x128xbf16, #tpu.memory_space<vmem>>, vector<256x128xbf16>
    %cst = arith.constant dense<0.000000e+00> : vector<128x128xf32>
    %6 = tpu.matmul %4, %5, %cst {dimension_numbers = #tpu.dot_dimension_numbers<[1], [0], [0], [1], [0, 0, 1, 1], [], []>} : vector<128x256xbf16>, vector<256x128xbf16>, vector<128x128xf32> -> vector<128x128xf32>
    %7 = arith.addf %3, %6 : vector<128x128xf32>
    %c0_6 = arith.constant 0 : index
    %c0_7 = arith.constant 0 : index
    %8 = vector.load %arg7[%c0_6, %c0_7] : memref<128x128xf32, #tpu.memory_space<vmem>>, vector<128x128xf32>
    tpu.vector_store %arg7[%c0_6, %c0_7], %7 {strides = array<i32>} : memref<128x128xf32, #tpu.memory_space<vmem>>, vector<128x128xf32>,
    %c0_i32_8 = arith.constant 0 : i32
    %9 = arith.cmpi eq, %arg2, %c0_i32_8 : i32
    %10 = arith.extui %9 : i1 to i32
    %c0_i32_9 = arith.constant 0 : i32
    %11 = arith.cmpi ne, %10, %c0_i32_9 : i32
    scf.if %11 {
      %c0_10 = arith.constant 0 : index
      %c0_11 = arith.constant 0 : index
      %12 = vector.load %arg7[%c0_10, %c0_11] : memref<128x128xf32, #tpu.memory_space<vmem>>, vector<128x128xf32>
      %c0_12 = arith.constant 0 : index
      %c0_13 = arith.constant 0 : index
      %13 = vector.load %arg5[%c0_12, %c0_13] : memref<1x128xf32, #tpu.memory_space<vmem>>, vector<1x128xf32>
      %14 = vector.broadcast %13 : vector<1x128xf32> to vector<128x128xf32>
      %15 = arith.addf %12, %14 : vector<128x128xf32>
      %cst_14 = arith.constant 0.000000e+00 : f32
      %16 = vector.broadcast %cst_14 : f32 to vector<128x128xf32>
      %17 = arith.maximumf %15, %16 : vector<128x128xf32>
      %18 = arith.truncf %17 : vector<128x128xf32> to vector<128x128xbf16>
      %c0_15 = arith.constant 0 : index
      %c0_16 = arith.constant 0 : index
      %19 = vector.load %arg6[%c0_15, %c0_16] : memref<128x128xbf16, #tpu.memory_space<vmem>>, vector<128x128xbf16>
      tpu.vector_store %arg6[%c0_15, %c0_16], %18 {strides = array<i32>} : memref<128x128xbf16, #tpu.memory_space<vmem>>, vector<128x128xbf16>,
    } else {
    }
    return
  }
  func.func @transform_0(%arg0: i32, %arg1: i32, %arg2: i32) -> (i32, i32) {
    %c0_i32 = arith.constant 0 : i32
    return %arg0, %arg2 : i32, i32
  }
  func.func @transform_1(%arg0: i32, %arg1: i32, %arg2: i32) -> (i32, i32) {
    %c0_i32 = arith.constant 0 : i32
    return %arg2, %arg1 : i32, i32
  }
  func.func @transform_2(%arg0: i32, %arg1: i32, %arg2: i32) -> (i32, i32) {
    %c0_i32 = arith.constant 0 : i32
    %c0_i32_0 = arith.constant 0 : i32
    return %c0_i32, %arg1 : i32, i32
  }
  func.func @transform_3(%arg0: i32, %arg1: i32, %arg2: i32) -> (i32, i32) {
    %c0_i32 = arith.constant 0 : i32
    return %arg0, %arg1 : i32, i32
  }
}

</mosaic_0001>

<bundles_post_ra>
// kernel: conv_bn.1
= control target key start
LH: loop header
LB: loop body
LE: loop exit
PB: predicated region body
PF: predicated region fallthrough
CT: control target
= control target key end

     0   :  { %s959_s0 = inlined_call_operand.vmem [shape: bf16[128,256], index: 0, kind: input, shape index: {}]   ;;  %s960_s1 = inlined_call_operand.vmem [shape: bf16[256,128], index: 1, kind: input, shape index: {}]   ;;  %s961_s2 = inlined_call_operand.vmem [shape: f32[1,128], index: 2, kind: input, shape index: {}]   ;;  %s962_s3 = inlined_call_operand.hbm [shape: bf16[128,128], index: 3, kind: output, shape index: {}]  }
   0x1   :  { %v754_v0 = vld [vmem:[%s960_s1 + $0x78] sm:$0xff]   ;;  %v756_v2 = vld [vmem:[%s960_s1 + $0x70] sm:$0xff]   ;;  %v758_v4 = vld [vmem:[%s960_s1 + $0x68] sm:$0xff]  }
   0x2   :  { %v755_v1 = vld [vmem:[%s960_s1 + $0x38] sm:$0xff]   ;;  %671 = vmatprep.subr.bf16.mxu0 %v754_v0  ;;  %735 = vmatprep.subr.bf16.mxu1 %v754_v0  ;;  %v757_v3 = vld [vmem:[%s960_s1 + $0x30] sm:$0xff]   ;;  %v759_v5 = vld [vmem:[%s960_s1 + $0x28] sm:$0xff]  }
   0x3   :  { %672 = vmatpush3.bf16.msra.mxu0 %v755_v1  ;;  %743 = vmatpush3.bf16.msra.mxu1 %v755_v1  ;;  %v760_v6 = vld [vmem:[%s960_s1 + $0x60] sm:$0xff]   ;;  %v762_v8 = vld [vmem:[%s960_s1 + $0x58] sm:$0xff]   ;;  %v764_v10 = vld [vmem:[%s960_s1 + $0x50] sm:$0xff]  }
   0x4   :  { %673 = vmatprep.subr.bf16.mxu0 %v756_v2  ;;  %736 = vmatprep.subr.bf16.mxu1 %v756_v2  ;;  %v761_v7 = vld [vmem:[%s960_s1 + $0x20] sm:$0xff]   ;;  %v763_v9 = vld [vmem:[%s960_s1 + $0x18] sm:$0xff]   ;;  %v765_v13 = vld [vmem:[%s960_s1 + $0x10] sm:$0xff]  }
   0x5   :  { %v772_v11 = vld [vmem:[%s959_s0 + $0x4] ss:$8 sps:$4 sm:$0xff]  }
   0x6   :  { %v775_v12 = vld [vmem:[%s959_s0 + $0x44] ss:$8 sps:$4 sm:$0xff]   ;;  %308 = vmatprep.mubr.bf16.mxu0 %v772_v11 }
   0x7   :  { %674 = vmatpush3.bf16.msra.mxu0 %v757_v3  ;;  %744 = vmatpush3.bf16.msra.mxu1 %v757_v3  ;;  %v766_v14 = vld [vmem:[%s960_s1 + $0x48] sm:$0xff]   ;;  %v768_v16 = vld [vmem:[%s960_s1 + $0x40] sm:$0xff]  }
   0x8   :  { %675 = vmatprep.subr.bf16.mxu0 %v758_v4  ;;  %737 = vmatprep.subr.bf16.mxu1 %v758_v4  ;;  %v767_v15 = vld [vmem:[%s960_s1 + $0x8] sm:$0xff]  }
   0x9   :  { %340 = vmatprep.mubr.bf16.mxu1 %v775_v12 }
   0xb   :  { %676 = vmatpush3.bf16.msra.mxu0 %v759_v5  ;;  %745 = vmatpush3.bf16.msra.mxu1 %v759_v5 }
   0xc   :  { %677 = vmatprep.subr.bf16.mxu0 %v760_v6  ;;  %738 = vmatprep.subr.bf16.mxu1 %v760_v6 }
   0xf   :  { %678 = vmatpush3.bf16.msra.mxu0 %v761_v7  ;;  %746 = vmatpush3.bf16.msra.mxu1 %v761_v7 }
  0x10   :  { %679 = vmatprep.subr.bf16.mxu0 %v762_v8  ;;  %739 = vmatprep.subr.bf16.mxu1 %v762_v8 }
  0x13   :  { %680 = vmatpush3.bf16.msra.mxu0 %v763_v9  ;;  %747 = vmatpush3.bf16.msra.mxu1 %v763_v9 }
  0x14   :  { %681 = vmatprep.subr.bf16.mxu0 %v764_v10  ;;  %740 = vmatprep.subr.bf16.mxu1 %v764_v10 }
  0x17   :  { %682 = vmatpush3.bf16.msra.mxu0 %v765_v13  ;;  %748 = vmatpush3.bf16.msra.mxu1 %v765_v13 }
  0x18   :  { %683 = vmatprep.subr.bf16.mxu0 %v766_v14  ;;  %741 = vmatprep.subr.bf16.mxu1 %v766_v14 }
  0x19   :  { %8 = vsyncpa [#allocation4], 0  ;;  %v769_v17 = vld [vmem:[%s960_s1] sm:$0xff]   ;;  %v776_v20 = vld [vmem:[%s959_s0 + $0x14] ss:$8 sps:$4 sm:$0xff]  }
  0x1a   :  { %v770_v18 = vld [vmem:[%s959_s0] ss:$8 sps:$4 sm:$0xff]   ;;  %v778_v21 = vld [vmem:[%s959_s0 + $0x54] ss:$8 sps:$4 sm:$0xff]   ;;  %v780_v22 = vld [vmem:[%s959_s0 + $0x10] ss:$8 sps:$4 sm:$0xff]  }
  0x1b   :  { %684 = vmatpush3.bf16.msra.mxu0 %v767_v15  ;;  %749 = vmatpush3.bf16.msra.mxu1 %v767_v15  ;;  %v773_v19 = vld [vmem:[%s959_s0 + $0x40] ss:$8 sps:$4 sm:$0xff]   ;;  %v781_v23 = vld [vmem:[%s959_s0 + $0x50] ss:$8 sps:$4 sm:$0xff]   ;;  %v782_v24 = vld [vmem:[%s959_s0 + $0x24] ss:$8 sps:$4 sm:$0xff]  }
  0x1c   :  { %685 = vmatprep.subr.bf16.mxu0 %v768_v16  ;;  %742 = vmatprep.subr.bf16.mxu1 %v768_v16  ;;  %v784_v25 = vld [vmem:[%s959_s0 + $0x64] ss:$8 sps:$4 sm:$0xff]   ;;  %v786_v26 = vld [vmem:[%s959_s0 + $0x20] ss:$8 sps:$4 sm:$0xff]   ;;  %v788_v28 = vld [vmem:[%s959_s0 + $0x34] ss:$8 sps:$4 sm:$0xff]  }
  0x1d   :  { %v787_v27 = vld [vmem:[%s959_s0 + $0x60] ss:$8 sps:$4 sm:$0xff]   ;;  %v790_v29 = vld [vmem:[%s959_s0 + $0x74] ss:$8 sps:$4 sm:$0xff]   ;;  %v792_v30 = vld [vmem:[%s959_s0 + $0x30] ss:$8 sps:$4 sm:$0xff]  }
  0x1e   :  { %v793_v31 = vld [vmem:[%s959_s0 + $0x70] ss:$8 sps:$4 sm:$0xff]   ;;  %v938_v37 = vld [vmem:[%s961_s2] ss:$0 sm:$0xff]  ;;  %s816_s0 = smov [#allocation3]  }
  0x1f   :  { %686 = vmatpush3.bf16.msra.mxu0 %v769_v17  ;;  %750 = vmatpush3.bf16.msra.mxu1 %v769_v17  ;;  %s548_s2 = sshll.u32 %s816_s0, 4  ;;  %s549_s2 = int_to_ptr.vmem [resolvable:$true] %s548_s2 }
  0x20   :  { %s794_s23 = scalar_lea.vmem %s549_s2, 1024  ;;  %p799_p1 = scmp.lt.s32.totalorder %s549_s2, %s549_s2 }
  0x21   :  { %p795_p0 = scmp.ne.s32.totalorder %s549_s2, %s794_s23  ;;  %p800_p2 = scmp.lt.s32.totalorder %s794_s23, %s794_s23 }
  0x22   :  { %309 = vmatmul.mubr.bf16.vlgmr.msra.gmra.mxu0 %v770_v18  ;;  %341 = vmatmul.mubr.bf16.vlgmr.msra.gmra.mxu1 %v773_v19 }
  0x23   :  { %316 = vmatprep.mubr.bf16.mxu0 %v776_v20  ;;  %348 = vmatprep.mubr.bf16.mxu1 %v778_v21  ;;  %p801_p3 = por %p800_p2, %p799_p1 }
  0x25   :  { %p802_p4 = pnand %p801_p3, %p795_p0 }
  0x2a   :  { %317 = vmatmul.mubr.bf16.gmra.mxu0 %v780_v22  ;;  %349 = vmatmul.mubr.bf16.gmra.mxu1 %v781_v23 }
  0x2b   :  { %324 = vmatprep.mubr.bf16.mxu0 %v782_v24  ;;  %356 = vmatprep.mubr.bf16.mxu1 %v784_v25 }
  0x32   :  { %325 = vmatmul.mubr.bf16.gmra.mxu0 %v786_v26  ;;  %357 = vmatmul.mubr.bf16.gmra.mxu1 %v787_v27 }
  0x33   :  { %332 = vmatprep.mubr.bf16.mxu0 %v788_v28  ;;  %364 = vmatprep.mubr.bf16.mxu1 %v790_v29 }
  0x3a   :  { %333 = vmatmul.mubr.bf16.gmra.mxu0 %v792_v30  ;;  %365 = vmatmul.mubr.bf16.gmra.mxu1 %v793_v31 }
  0xe2   :  { %v687_v32 = vpop.f32.mrf.mxu0  ;;  %v711_v33 = vpop.f32.mrf.mxu1 }
  0xe4   :  { %v688_v34 = vpop.f32.mrf.mxu0  ;;  %v712_v35 = vpop.f32.mrf.mxu1 }
  0xe5   :  { %v689_v36 = vadd.f32 %v688_v34, %v687_v32  ;;  %v713_v38 = vadd.f32 %v712_v35, %v711_v33 }
  0xe6   :  { %v690_v39 = vpop.f32.mrf.mxu0  ;;  %v714_v40 = vpop.f32.mrf.mxu1 }
  0xe7   :  { %v431_v41 = vadd.f32 %v689_v36, %v938_v37  ;;  %v439_v42 = vadd.f32 %v713_v38, %v938_v37 }
  0xe8   :  { %v691_v43 = vpop.f32.mrf.mxu0  ;;  %v715_v44 = vpop.f32.mrf.mxu1 }
  0xe9   :  { %v692_v45 = vadd.f32 %v691_v43, %v690_v39  ;;  %v716_v46 = vadd.f32 %v715_v44, %v714_v40  ;;  %v447_v51 = vmax.f32 %v431_v41, 0.0  ;;  %v455_v52 = vmax.f32 %v439_v42, 0.0 }
  0xea   :  { %v693_v47 = vpop.f32.mrf.mxu0  ;;  %v717_v48 = vpop.f32.mrf.mxu1 }
  0xeb   :  { %v432_v49 = vadd.f32 %v692_v45, %v938_v37  ;;  %v440_v50 = vadd.f32 %v716_v46, %v938_v37 }
  0xec   :  { %v694_v53 = vpop.f32.mrf.mxu0  ;;  %v718_v54 = vpop.f32.mrf.mxu1 }
  0xed   :  { %v448_v55 = vmax.f32 %v432_v49, 0.0  ;;  %v456_v56 = vmax.f32 %v440_v50, 0.0  ;;  %v695_v57 = vadd.f32 %v694_v53, %v693_v47  ;;  %v719_v58 = vadd.f32 %v718_v54, %v717_v48 }
  0xee   :  { %v696_v59 = vpop.f32.mrf.mxu0  ;;  %v720_v60 = vpop.f32.mrf.mxu1 }
  0xef   :  { %v627_v61 = vpack.c.bf16 %v448_v55, %v447_v51  ;;  %v647_v62 = vpack.c.bf16 %v456_v56, %v455_v52  ;;  %v433_v63 = vadd.f32 %v695_v57, %v938_v37  ;;  %v441_v0 = vadd.f32 %v719_v58, %v938_v37 }
  0xf0   :  { %v697_v1 = vpop.f32.mrf.mxu0  ;;  %v721_v2 = vpop.f32.mrf.mxu1 }
  0xf1   :  { %628 = vst [vmem:[#allocation3] sm:$0xff] %v627_v61   ;;  %667 = vst [vmem:[#allocation3 + $0x20] sm:$0xff] %v647_v62   ;;  %v698_v3 = vadd.f32 %v697_v1, %v696_v59  ;;  %v722_v4 = vadd.f32 %v721_v2, %v720_v60  ;;  %v449_v9 = vmax.f32 %v433_v63, 0.0  ;;  %v457_v10 = vmax.f32 %v441_v0, 0.0 }
  0xf2   :  { %v699_v5 = vpop.f32.mrf.mxu0  ;;  %v723_v6 = vpop.f32.mrf.mxu1 }
  0xf3   :  { %v434_v7 = vadd.f32 %v698_v3, %v938_v37  ;;  %v442_v8 = vadd.f32 %v722_v4, %v938_v37 }
  0xf4   :  { %v700_v11 = vpop.f32.mrf.mxu0  ;;  %v724_v12 = vpop.f32.mrf.mxu1 }
  0xf5   :  { %v450_v13 = vmax.f32 %v434_v7, 0.0  ;;  %v458_v14 = vmax.f32 %v442_v8, 0.0  ;;  %v701_v15 = vadd.f32 %v700_v11, %v699_v5  ;;  %v725_v16 = vadd.f32 %v724_v12, %v723_v6 }
  0xf6   :  { %v702_v17 = vpop.f32.mrf.mxu0  ;;  %v726_v18 = vpop.f32.mrf.mxu1 }
  0xf7   :  { %v632_v19 = vpack.c.bf16 %v450_v13, %v449_v9  ;;  %v652_v20 = vpack.c.bf16 %v458_v14, %v457_v10  ;;  %v435_v21 = vadd.f32 %v701_v15, %v938_v37  ;;  %v443_v22 = vadd.f32 %v725_v16, %v938_v37 }
  0xf8   :  { %v703_v23 = vpop.f32.mrf.mxu0  ;;  %v727_v24 = vpop.f32.mrf.mxu1 }
  0xf9   :  { %664 = vst [vmem:[#allocation3 + $0x8] sm:$0xff] %v632_v19   ;;  %668 = vst [vmem:[#allocation3 + $0x28] sm:$0xff] %v652_v20   ;;  %v704_v25 = vadd.f32 %v703_v23, %v702_v17  ;;  %v728_v26 = vadd.f32 %v727_v24, %v726_v18  ;;  %v451_v31 = vmax.f32 %v435_v21, 0.0  ;;  %v459_v32 = vmax.f32 %v443_v22, 0.0 }
  0xfa   :  { %v705_v27 = vpop.f32.mrf.mxu0  ;;  %v729_v28 = vpop.f32.mrf.mxu1 }
  0xfb   :  { %v436_v29 = vadd.f32 %v704_v25, %v938_v37  ;;  %v444_v30 = vadd.f32 %v728_v26, %v938_v37 }
  0xfc   :  { %v706_v33 = vpop.f32.mrf.mxu0  ;;  %v730_v34 = vpop.f32.mrf.mxu1 }
  0xfd   :  { %v452_v35 = vmax.f32 %v436_v29, 0.0  ;;  %v460_v36 = vmax.f32 %v444_v30, 0.0  ;;  %v707_v38 = vadd.f32 %v706_v33, %v705_v27  ;;  %v731_v39 = vadd.f32 %v730_v34, %v729_v28 }
  0xfe   :  { %v708_v40 = vpop.f32.mrf.mxu0  ;;  %v732_v41 = vpop.f32.mrf.mxu1 }
  0xff   :  { %v637_v42 = vpack.c.bf16 %v452_v35, %v451_v31  ;;  %v657_v43 = vpack.c.bf16 %v460_v36, %v459_v32  ;;  %v437_v46 = vadd.f32 %v707_v38, %v938_v37  ;;  %v445_v47 = vadd.f32 %v731_v39, %v938_v37 }
 0x100   :  { %v709_v44 = vpop.f32.mrf.mxu0  ;;  %v733_v45 = vpop.f32.mrf.mxu1 }
 0x101   :  { %665 = vst [vmem:[#allocation3 + $0x10] sm:$0xff] %v637_v42   ;;  %669 = vst [vmem:[#allocation3 + $0x30] sm:$0xff] %v657_v43   ;;  %v710_v48 = vadd.f32 %v709_v44, %v708_v40  ;;  %v734_v49 = vadd.f32 %v733_v45, %v732_v41  ;;  %v453_v52 = vmax.f32 %v437_v46, 0.0  ;;  %v461_v53 = vmax.f32 %v445_v47, 0.0 }
 0x103   :  { %v438_v50 = vadd.f32 %v710_v48, %v938_v37  ;;  %v446_v51 = vadd.f32 %v734_v49, %v938_v37 }
 0x105   :  { %v454_v54 = vmax.f32 %v438_v50, 0.0  ;;  %v462_v55 = vmax.f32 %v446_v51, 0.0 }
 0x107   :  { %v642_v56 = vpack.c.bf16 %v454_v54, %v453_v52  ;;  %v662_v57 = vpack.c.bf16 %v462_v55, %v461_v53 }
 0x109   :  { %666 = vst [vmem:[#allocation3 + $0x18] sm:$0xff] %v642_v56   ;;  %670 = vst [vmem:[#allocation3 + $0x38] sm:$0xff] %v662_v57  }
 0x10a   :  { %805 = shalt.err (!%p802_p4)
}
 0x10b   :  { %s817_s24 = smov 64   ;;  %s818_s25 = smov 4  }
 0x10c   :  { %554 = dma.vmem_to_hbm [thread:$0]  %s549_s2, 1024, %s962_s3, [#allocation4], %s817_s24, %s817_s24, %s818_s25  }
 0x10d   :  { %814 = dma.done.wait [#allocation4], 1024  }
 0x10e   :  { %815 = vsyncadd [#allocation4], 4294966272 }
 0x10f   :  { %558 = vsyncpa [#allocation4], 1 }

</bundles_post_ra>
